<compile_context>
chip_gen: v5e
topology: v5e:2x2
jax: 0.10.0
libtpu: 0.0.40
codegen_flags: <defaults>
</compile_context>

<pallas_src>
import functools

import jax
import jax.numpy as jnp
from jax.experimental import pallas as pl
from jax.experimental.pallas import tpu as pltpu

LN_EPS = 1e-5
_INV_SQRT_2 = 0.7071067811865476

# Stay well under v7x's 64 MiB physical VMEM (also below v5e/v6e capacity).
_VMEM_BUDGET_BYTES = 40 * 1024 * 1024
_VMEM_LIMIT_BYTES = 48 * 1024 * 1024


def _round_up(n, m):
    return ((n + m - 1) // m) * m


def _choose_tm(batch, d_in, d_out):
    """Pick a batch tile (multiple of 8) that keeps VMEM under budget."""
    # Weight + bias are resident; count them double-buffered to be conservative.
    fixed = 2 * (d_in * d_out + d_out) * 4
    # Per batch-row: 2x input block + 2x output block + f32 intermediate h.
    per_row = (2 * d_in + 2 * d_out + d_out) * 4
    avail = max(_VMEM_BUDGET_BYTES - fixed, per_row * 8)
    tm = avail // per_row
    tm = min(tm, 1024, _round_up(batch, 8))
    tm = max(8, (tm // 8) * 8)
    return int(tm)


def _linear_gelu_kernel(x_ref, w_ref, b_ref, o_ref, *, use_bf16_matmul):
    x = x_ref[...]            # (TM, D_in)
    w = w_ref[...]            # (D_out, D_in)  -- PyTorch layout, no transpose
    if use_bf16_matmul:
        # Faster MXU path on v6e/v7x; accumulation stays f32.
        x = x.astype(jnp.bfloat16)
        w = w.astype(jnp.bfloat16)

    # h = x @ W^T + b, contracting over D_in, f32 accumulation on the MXU.
    h = jax.lax.dot_general(
        x, w,
        dimension_numbers=(((1,), (1,)), ((), ())),
        preferred_element_type=jnp.float32,
    )
    h = h + b_ref[...]        # (TM, D_out) + (1, D_out) broadcast

    # LayerNorm over the last dim (biased variance, eps=1e-5, no affine).
    mean = jnp.mean(h, axis=-1, keepdims=True)
    centered = h - mean
    var = jnp.mean(centered * centered, axis=-1, keepdims=True)
    hn = centered * jax.lax.rsqrt(var + LN_EPS)   # rsqrt -> EUP slot

    # GELU (exact, erf-based -- matches PyTorch's default nn.GELU()).
    g = 0.5 * hn * (1.0 + jax.lax.erf(hn * _INV_SQRT_2))

    o_ref[...] = g.astype(o_ref.dtype)


def linear_gelu(x, weight, bias, *, tm=None, use_bf16_matmul=False):
    """x: (B, D_in); weight: (D_out, D_in) (PyTorch layout); bias: (D_out,)."""
    B, D_in = x.shape
    D_out, D_in_w = weight.shape
    assert D_in == D_in_w, "weight must be (D_out, D_in)"
    b2 = bias.reshape(1, D_out)

    if tm is None:
        tm = _choose_tm(B, D_in, D_out)

    # Pad the batch so every grid step sees a full tile; padded rows are
    # independent under per-row LayerNorm and are sliced off below.
    B_pad = _round_up(B, tm)
    x_in = x if B_pad == B else jnp.pad(x, ((0, B_pad - B), (0, 0)))
    grid = (B_pad // tm,)

    # TODO(synk): for very large D_in*D_out that exceed the VMEM budget, add a
    # K reduction grid axis with a (tm, D_out) f32 accumulator and do
    # bias + LayerNorm + GELU in a pl.when(k == last) finalize block.
    kernel = functools.partial(_linear_gelu_kernel,
                               use_bf16_matmul=use_bf16_matmul)

    out = pl.pallas_call(
        kernel,
        out_shape=jax.ShapeDtypeStruct((B_pad, D_out), x.dtype),
        grid_spec=pltpu.PrefetchScalarGridSpec(
            num_scalar_prefetch=0,
            grid=grid,
            in_specs=[
                pl.BlockSpec((tm, D_in), lambda i: (i, 0)),       # streamed x tile
                pl.BlockSpec((D_out, D_in), lambda i: (0, 0)),    # resident weight
                pl.BlockSpec((1, D_out), lambda i: (0, 0)),       # resident bias
            ],
            out_specs=pl.BlockSpec((tm, D_out), lambda i: (i, 0)),
        ),
        compiler_params=pltpu.CompilerParams(
            dimension_semantics=("parallel",),
            vmem_limit_bytes=_VMEM_LIMIT_BYTES,
        ),
    )(x_in, weight, b2)

    return out if B_pad == B else out[:B]


def reference(x, weight, bias):
    h = x @ weight.T + bias
    mean = h.mean(-1, keepdims=True)
    var = ((h - mean) ** 2).mean(-1, keepdims=True)
    hn = (h - mean) / jnp.sqrt(var + LN_EPS)
    return 0.5 * hn * (1.0 + jax.lax.erf(hn * _INV_SQRT_2))


if __name__ == "__main__":
    # Lane-dense shapes (D_out multiple of 128) so stores are unmasked, but
    # still small. nn.Linear shapes: W (D_out, D_in), b (D_out,).
    B, D_in, D_out = 16, 128, 256

    key = jax.random.PRNGKey(0)
    kx, kw, kb = jax.random.split(key, 3)

    x = jax.random.normal(kx, (B, D_in), dtype=jnp.float32)
    bound = 1.0 / (D_in ** 0.5)
    weight = jax.random.uniform(kw, (D_out, D_in), minval=-bound, maxval=bound,
                                dtype=jnp.float32)
    bias = jax.random.uniform(kb, (D_out,), minval=-bound, maxval=bound,
                              dtype=jnp.float32)

    out = linear_gelu(x, weight, bias)
    jax.block_until_ready(out)

    ref = reference(x, weight, bias)
    assert out.shape == (B, D_out)
    assert jnp.allclose(out, ref, atol=2e-5, rtol=2e-5)

    # Exercise a non-multiple batch to check the padding path.
    out2 = linear_gelu(x[:11], weight, bias)
    jax.block_until_ready(out2)
    assert jnp.allclose(out2, ref[:11], atol=2e-5, rtol=2e-5)

    print("KERNEL_OK")
</pallas_src>

<mosaic_0001>
module attributes {stable_mosaic.version = 11 : i64} {
  func.func @_linear_gelu_kernel(%arg0: i32, %arg1: memref<16x128xf32, #tpu.memory_space<vmem>>, %arg2: memref<256x128xf32, #tpu.memory_space<vmem>>, %arg3: memref<1x256xf32, #tpu.memory_space<vmem>>, %arg4: memref<16x256xf32, #tpu.memory_space<vmem>>) attributes {dimension_semantics = [#tpu.dimension_semantics<parallel>], iteration_bounds = array<i64: 1>, scalar_prefetch = 0 : i64, scratch_operands = 0 : i64, tpu.core_type = #tpu.core_type<tc>, window_params = [{transform_indices = @transform_0, window_bounds = array<i64: 16, 128>}, {pipeline_mode = #tpu.pipeline_mode<synchronous>, transform_indices = @transform_1, window_bounds = array<i64: 256, 128>}, {pipeline_mode = #tpu.pipeline_mode<synchronous>, transform_indices = @transform_2, window_bounds = array<i64: 1, 256>}, {transform_indices = @transform_3, window_bounds = array<i64: 16, 256>}]} {
    %c0 = arith.constant 0 : index
    %c0_0 = arith.constant 0 : index
    %0 = vector.load %arg1[%c0, %c0_0] : memref<16x128xf32, #tpu.memory_space<vmem>>, vector<16x128xf32>
    %c0_1 = arith.constant 0 : index
    %c0_2 = arith.constant 0 : index
    %1 = vector.load %arg2[%c0_1, %c0_2] : memref<256x128xf32, #tpu.memory_space<vmem>>, vector<256x128xf32>
    %cst = arith.constant dense<0.000000e+00> : vector<16x256xf32>
    %2 = tpu.matmul %0, %1, %cst {dimension_numbers = #tpu.dot_dimension_numbers<[1], [1], [0], [0], [0, 0, 1, 0], [], []>} : vector<16x128xf32>, vector<256x128xf32>, vector<16x256xf32> -> vector<16x256xf32>
    %c0_3 = arith.constant 0 : index
    %c0_4 = arith.constant 0 : index
    %3 = vector.load %arg3[%c0_3, %c0_4] : memref<1x256xf32, #tpu.memory_space<vmem>>, vector<1x256xf32>
    %4 = vector.broadcast %3 : vector<1x256xf32> to vector<16x256xf32>
    %5 = arith.addf %2, %4 : vector<16x256xf32>
    %cst_5 = arith.constant dense<0.000000e+00> : vector<16xf32>
    %6 = vector.multi_reduction <add>, %5, %cst_5 [1] : vector<16x256xf32> to vector<16xf32>
    %7 = vector.shape_cast %6 : vector<16xf32> to vector<16x1xf32>
    %cst_6 = arith.constant 2.560000e+02 : f32
    %8 = vector.broadcast %cst_6 : f32 to vector<16x1xf32>
    %9 = arith.divf %7, %8 : vector<16x1xf32>
    %10 = vector.broadcast %9 : vector<16x1xf32> to vector<16x256xf32>
    %11 = arith.subf %5, %10 : vector<16x256xf32>
    %12 = arith.mulf %11, %11 : vector<16x256xf32>
    %cst_7 = arith.constant dense<0.000000e+00> : vector<16xf32>
    %13 = vector.multi_reduction <add>, %12, %cst_7 [1] : vector<16x256xf32> to vector<16xf32>
    %14 = vector.shape_cast %13 : vector<16xf32> to vector<16x1xf32>
    %cst_8 = arith.constant 2.560000e+02 : f32
    %15 = vector.broadcast %cst_8 : f32 to vector<16x1xf32>
    %16 = arith.divf %14, %15 : vector<16x1xf32>
    %cst_9 = arith.constant 9.99999974E-6 : f32
    %17 = vector.broadcast %cst_9 : f32 to vector<16x1xf32>
    %18 = arith.addf %16, %17 : vector<16x1xf32>
    %19 = math.rsqrt %18 : vector<16x1xf32>
    %20 = vector.broadcast %19 : vector<16x1xf32> to vector<16x256xf32>
    %21 = arith.mulf %11, %20 : vector<16x256xf32>
    %cst_10 = arith.constant 5.000000e-01 : f32
    %22 = vector.broadcast %cst_10 : f32 to vector<16x256xf32>
    %23 = arith.mulf %22, %21 : vector<16x256xf32>
    %cst_11 = arith.constant 0.707106769 : f32
    %24 = vector.broadcast %cst_11 : f32 to vector<16x256xf32>
    %25 = arith.mulf %21, %24 : vector<16x256xf32>
    %26 = math.erf %25 : vector<16x256xf32>
    %cst_12 = arith.constant 1.000000e+00 : f32
    %27 = vector.broadcast %cst_12 : f32 to vector<16x256xf32>
    %28 = arith.addf %27, %26 : vector<16x256xf32>
    %29 = arith.mulf %23, %28 : vector<16x256xf32>
    %c0_13 = arith.constant 0 : index
    %c0_14 = arith.constant 0 : index
    %30 = vector.load %arg4[%c0_13, %c0_14] : memref<16x256xf32, #tpu.memory_space<vmem>>, vector<16x256xf32>
    tpu.vector_store %arg4[%c0_13, %c0_14], %29 {strides = array<i32>} : memref<16x256xf32, #tpu.memory_space<vmem>>, vector<16x256xf32>,
    return
  }
  func.func @transform_0(%arg0: i32) -> (i32, i32) {
    %c0_i32 = arith.constant 0 : i32
    %c0_i32_0 = arith.constant 0 : i32
    return %arg0, %c0_i32 : i32, i32
  }
  func.func @transform_1(%arg0: i32) -> (i32, i32) {
    %c0_i32 = arith.constant 0 : i32
    %c0_i32_0 = arith.constant 0 : i32
    %c0_i32_1 = arith.constant 0 : i32
    return %c0_i32, %c0_i32_0 : i32, i32
  }
  func.func @transform_2(%arg0: i32) -> (i32, i32) {
    %c0_i32 = arith.constant 0 : i32
    %c0_i32_0 = arith.constant 0 : i32
    %c0_i32_1 = arith.constant 0 : i32
    return %c0_i32, %c0_i32_0 : i32, i32
  }
  func.func @transform_3(%arg0: i32) -> (i32, i32) {
    %c0_i32 = arith.constant 0 : i32
    %c0_i32_0 = arith.constant 0 : i32
    return %arg0, %c0_i32 : i32, i32
  }
}

</mosaic_0001>

<bundles_post_ra>
// kernel: tpu_custom_call.1
= control target key start
LH: loop header
LB: loop body
LE: loop exit
PB: predicated region body
PF: predicated region fallthrough
CT: control target
= control target key end

     0   :  { %8 = vsyncpa [#allocation3], 0  ;;  %s685_s0 = inlined_call_operand.hbm [shape: f32[16,128], index: 0, kind: input, shape index: {}]   ;;  %s686_s1 = inlined_call_operand.hbm [shape: f32[256,128], index: 1, kind: input, shape index: {}]   ;;  %s687_s2 = inlined_call_operand.hbm [shape: f32[1,256], index: 2, kind: input, shape index: {}]   ;;  %s688_s3 = inlined_call_operand.hbm [shape: f32[16,256], index: 3, kind: output, shape index: {}]  }
   0x1   :  { %9 = vsyncpa [#allocation6], 0 }
   0x2   :  { %10 = vsyncpa [#allocation4], 0  ;;  %s28_s14 = sshll.u32 %s686_s1, 4  ;;  %s564_s15 = smov [#allocation5]   ;;  %s29_s14 = int_to_ptr.hbm [resolvable:$true] %s28_s14 }
   0x3   :  { %s30_s16 = sshll.u32 %s564_s15, 4  ;;  %s15_s19 = sshll.u32 %s685_s0, 4  ;;  %s31_s16 = int_to_ptr.vmem [resolvable:$true] %s30_s16  ;;  %s16_s19 = int_to_ptr.hbm [resolvable:$true] %s15_s19 }
   0x4   :  { %s565_s20 = smov 128   ;;  %s566_s21 = smov 8  }
   0x5   :  { %36 = dma.hbm_to_vmem [thread:$0]  %s29_s14, 4096, %s31_s16, [#allocation6], %s565_s20, %s565_s20, %s566_s21  }
   0x6   :  { %s567_s22 = smov [#allocation2]   ;;  %s42_s26 = sshll.u32 %s687_s2, 4  ;;  %s43_s26 = int_to_ptr.hbm [resolvable:$true] %s42_s26 }
   0x7   :  { %s17_s23 = sshll.u32 %s567_s22, 4  ;;  %s568_s1 = smov [#allocation7]   ;;  %s18_s23 = int_to_ptr.vmem [resolvable:$true] %s17_s23 }
   0x8   :  { %23 = dma.hbm_to_vmem [thread:$0]  %s16_s19, 256, %s18_s23, [#allocation3], %s565_s20, %s565_s20, %s566_s21  }
   0x9   :  { %s44_s27 = sshll.u32 %s568_s1, 4  ;;  %s45_s27 = int_to_ptr.vmem [resolvable:$true] %s44_s27 }
   0xa   :  { %47 = dma.hbm_to_vmem [thread:$0]  %s43_s26, 32, %s45_s27, [#allocation6]  }
   0xb   :  { %558 = dma.done.wait [#allocation3], 256  }
   0xc   :  { %559 = vsyncadd [#allocation3], 4294967040 }
   0xd   :  { %560 = dma.done.wait [#allocation6], 4128  }
   0xe   :  { %561 = vsyncadd [#allocation6], 4294963168  ;;  %v77_v0 = vld [vmem:[#allocation5 + $0x78] sm:$0xff]  ;;  %v76_v2 = vld [vmem:[#allocation5 + $0x70] sm:$0xff]  ;;  %v569_v47 = vmov 256.0   ;;  %s570_s0 = smov [#allocation8]  }
   0xf   :  { %v93_v1 = vld [vmem:[#allocation5 + $0xf8] sm:$0xff]  ;;  %100 = vmatpush.xpose.msra.mxu0 %v77_v0  ;;  %407 = vmatpush.xpose.msra.mxu2 %v77_v0  ;;  %v92_v3 = vld [vmem:[#allocation5 + $0xf0] sm:$0xff]  ;;  %v75_v4 = vld [vmem:[#allocation5 + $0x68] sm:$0xff]  ;;  %448 = vrcp.f32 %v569_v47  ;;  %s387_s2 = sshll.u32 %s570_s0, 4  ;;  %s389_s30 = sshll.u32 %s688_s3, 4  ;;  %s388_s2 = int_to_ptr.vmem [resolvable:$true] %s387_s2  ;;  %s390_s30 = int_to_ptr.hbm [resolvable:$true] %s389_s30 }
  0x10   :  { %123 = vmatpush.xpose.msra.mxu1 %v93_v1  ;;  %423 = vmatpush.xpose.msra.mxu3 %v93_v1  ;;  %v91_v5 = vld [vmem:[#allocation5 + $0xe8] sm:$0xff]  ;;  %v74_v6 = vld [vmem:[#allocation5 + $0x60] sm:$0xff]  ;;  %v73_v8 = vld [vmem:[#allocation5 + $0x58] sm:$0xff]  ;;  %s571_s4 = smov 256   ;;  %s572_s5 = smov 16  }
  0x11   :  { %v90_v7 = vld [vmem:[#allocation5 + $0xe0] sm:$0xff]  ;;  %v89_v9 = vld [vmem:[#allocation5 + $0xd8] sm:$0xff]  ;;  %v72_v10 = vld [vmem:[#allocation5 + $0x50] sm:$0xff] }
  0x12   :  { %v88_v11 = vld [vmem:[#allocation5 + $0xd0] sm:$0xff]  ;;  %v71_v12 = vld [vmem:[#allocation5 + $0x48] sm:$0xff]  ;;  %v70_v14 = vld [vmem:[#allocation5 + $0x40] sm:$0xff] }
  0x13   :  { %101 = vmatpush.xpose.msra.mxu0 %v76_v2  ;;  %408 = vmatpush.xpose.msra.mxu2 %v76_v2  ;;  %v87_v13 = vld [vmem:[#allocation5 + $0xc8] sm:$0xff]  ;;  %v86_v15 = vld [vmem:[#allocation5 + $0xc0] sm:$0xff]  ;;  %v69_v16 = vld [vmem:[#allocation5 + $0x38] sm:$0xff] }
  0x14   :  { %124 = vmatpush.xpose.msra.mxu1 %v92_v3  ;;  %424 = vmatpush.xpose.msra.mxu3 %v92_v3  ;;  %v85_v17 = vld [vmem:[#allocation5 + $0xb8] sm:$0xff]  ;;  %v68_v18 = vld [vmem:[#allocation5 + $0x30] sm:$0xff]  ;;  %v67_v20 = vld [vmem:[#allocation5 + $0x28] sm:$0xff] }
  0x15   :  { %v84_v19 = vld [vmem:[#allocation5 + $0xb0] sm:$0xff]  ;;  %v83_v21 = vld [vmem:[#allocation5 + $0xa8] sm:$0xff]  ;;  %v66_v22 = vld [vmem:[#allocation5 + $0x20] sm:$0xff]  ;;  %v449_v48 = vpop.eup %448 }
  0x16   :  { %v82_v23 = vld [vmem:[#allocation5 + $0xa0] sm:$0xff]  ;;  %v65_v24 = vld [vmem:[#allocation5 + $0x18] sm:$0xff]  ;;  %v64_v26 = vld [vmem:[#allocation5 + $0x10] sm:$0xff]  ;;  %v153_v49 = vmul.f32 256.0, %v449_v48  ;;  %vm157_vm0 = vweird.f32 %v449_v48 }
  0x17   :  { %102 = vmatpush.xpose.msra.mxu0 %v75_v4  ;;  %409 = vmatpush.xpose.msra.mxu2 %v75_v4  ;;  %v81_v25 = vld [vmem:[#allocation5 + $0x98] sm:$0xff]  ;;  %v80_v27 = vld [vmem:[#allocation5 + $0x90] sm:$0xff]  ;;  %v63_v28 = vld [vmem:[#allocation5 + $0x8] sm:$0xff] }
  0x18   :  { %125 = vmatpush.xpose.msra.mxu1 %v91_v5  ;;  %425 = vmatpush.xpose.msra.mxu3 %v91_v5  ;;  %v79_v29 = vld [vmem:[#allocation5 + $0x88] sm:$0xff]  ;;  %v62_v30 = vld [vmem:[#allocation5] sm:$0xff]  ;;  %v60_v32 = vld [vmem:[#allocation2] sm:$0xff]  ;;  %v154_v50 = vsub.f32 1.0, %v153_v49 }
  0x19   :  { %v78_v31 = vld [vmem:[#allocation5 + $0x80] sm:$0xff]  ;;  %v61_v33 = vld [vmem:[#allocation2 + $0x8] sm:$0xff] }
  0x1a   :  { %v94_v34 = vld [vmem:[#allocation7] sm:$0x3]  ;;  %v155_v51 = vmul.f32 %v449_v48, %v154_v50 }
  0x1b   :  { %103 = vmatpush.xpose.msra.mxu0 %v74_v6  ;;  %410 = vmatpush.xpose.msra.mxu2 %v74_v6  ;;  %v96_v35 = vperm.slane %v94_v34, 0  ;;  %v97_v36 = vperm.slane %v94_v34, 1 }
  0x1c   :  { %126 = vmatpush.xpose.msra.mxu1 %v90_v7  ;;  %426 = vmatpush.xpose.msra.mxu3 %v90_v7  ;;  %v156_v52 = vadd.f32 %v449_v48, %v155_v51 }
  0x1e   :  { %v158_v53 = vsel %vm157_vm0, %v449_v48, %v156_v52 }
  0x1f   :  { %104 = vmatpush.xpose.msra.mxu0 %v73_v8  ;;  %411 = vmatpush.xpose.msra.mxu2 %v73_v8 }
  0x20   :  { %127 = vmatpush.xpose.msra.mxu1 %v89_v9  ;;  %427 = vmatpush.xpose.msra.mxu3 %v89_v9 }
  0x23   :  { %105 = vmatpush.xpose.msra.mxu0 %v72_v10  ;;  %412 = vmatpush.xpose.msra.mxu2 %v72_v10 }
  0x24   :  { %128 = vmatpush.xpose.msra.mxu1 %v88_v11  ;;  %428 = vmatpush.xpose.msra.mxu3 %v88_v11 }
  0x27   :  { %106 = vmatpush.xpose.msra.mxu0 %v71_v12  ;;  %413 = vmatpush.xpose.msra.mxu2 %v71_v12 }
  0x28   :  { %129 = vmatpush.xpose.msra.mxu1 %v87_v13  ;;  %429 = vmatpush.xpose.msra.mxu3 %v87_v13 }
  0x2b   :  { %107 = vmatpush.xpose.msra.mxu0 %v70_v14  ;;  %414 = vmatpush.xpose.msra.mxu2 %v70_v14 }
  0x2c   :  { %130 = vmatpush.xpose.msra.mxu1 %v86_v15  ;;  %430 = vmatpush.xpose.msra.mxu3 %v86_v15 }
  0x2f   :  { %108 = vmatpush.xpose.msra.mxu0 %v69_v16  ;;  %415 = vmatpush.xpose.msra.mxu2 %v69_v16 }
  0x30   :  { %131 = vmatpush.xpose.msra.mxu1 %v85_v17  ;;  %431 = vmatpush.xpose.msra.mxu3 %v85_v17 }
  0x33   :  { %109 = vmatpush.xpose.msra.mxu0 %v68_v18  ;;  %416 = vmatpush.xpose.msra.mxu2 %v68_v18 }
  0x34   :  { %132 = vmatpush.xpose.msra.mxu1 %v84_v19  ;;  %432 = vmatpush.xpose.msra.mxu3 %v84_v19 }
  0x37   :  { %110 = vmatpush.xpose.msra.mxu0 %v67_v20  ;;  %417 = vmatpush.xpose.msra.mxu2 %v67_v20 }
  0x38   :  { %133 = vmatpush.xpose.msra.mxu1 %v83_v21  ;;  %433 = vmatpush.xpose.msra.mxu3 %v83_v21 }
  0x3b   :  { %111 = vmatpush.xpose.msra.mxu0 %v66_v22  ;;  %418 = vmatpush.xpose.msra.mxu2 %v66_v22 }
  0x3c   :  { %134 = vmatpush.xpose.msra.mxu1 %v82_v23  ;;  %434 = vmatpush.xpose.msra.mxu3 %v82_v23 }
  0x3f   :  { %112 = vmatpush.xpose.msra.mxu0 %v65_v24  ;;  %419 = vmatpush.xpose.msra.mxu2 %v65_v24 }
  0x40   :  { %135 = vmatpush.xpose.msra.mxu1 %v81_v25  ;;  %435 = vmatpush.xpose.msra.mxu3 %v81_v25 }
  0x43   :  { %113 = vmatpush.xpose.msra.mxu0 %v64_v26  ;;  %420 = vmatpush.xpose.msra.mxu2 %v64_v26 }
  0x44   :  { %136 = vmatpush.xpose.msra.mxu1 %v80_v27  ;;  %436 = vmatpush.xpose.msra.mxu3 %v80_v27 }
  0x47   :  { %114 = vmatpush.xpose.msra.mxu0 %v63_v28  ;;  %421 = vmatpush.xpose.msra.mxu2 %v63_v28 }
  0x48   :  { %137 = vmatpush.xpose.msra.mxu1 %v79_v29  ;;  %437 = vmatpush.xpose.msra.mxu3 %v79_v29 }
  0x4b   :  { %115 = vmatpush.xpose.msra.mxu0 %v62_v30  ;;  %422 = vmatpush.xpose.msra.mxu2 %v62_v30 }
  0x4c   :  { %138 = vmatpush.xpose.msra.mxu1 %v78_v31  ;;  %438 = vmatpush.xpose.msra.mxu3 %v78_v31 }
  0x4e   :  { %116 = vmatmul.f32.vlgmr.msra.gmra.mxu0 %v60_v32  ;;  %119 = vmatmul.f32.vlgmr.msra.gmra.mxu2 %v61_v33 }
  0x4f   :  { %139 = vmatmul.f32.vlgmr.msra.gmra.mxu1 %v60_v32  ;;  %142 = vmatmul.f32.vlgmr.msra.gmra.mxu3 %v61_v33 }
  0xcb   :  { %v117_v37 = vpop.f32.mrf.mxu0 }
  0xcc   :  { %v140_v38 = vpop.f32.mrf.mxu1  ;;  %v118_v39 = vadd.f32 %v117_v37, %v96_v35 }
  0xcd   :  { %v141_v40 = vadd.f32 %v140_v38, %v97_v36 }
  0xcf   :  { %v146_v41 = vadd.f32 %v141_v40, %v118_v39 }
  0xd1   :  { %147 = vadd.xlane.f32.xlu0 %v146_v41  ;;  %v120_v42 = vpop.f32.mrf.mxu2 }
  0xd2   :  { %v143_v43 = vpop.f32.mrf.mxu3  ;;  %v121_v44 = vadd.f32 %v120_v42, %v96_v35 }
  0xd3   :  { %v144_v45 = vadd.f32 %v143_v43, %v97_v36 }
  0xd5   :  { %v149_v46 = vadd.f32 %v144_v45, %v121_v44 }
  0xd9   :  { %150 = vadd.xlane.f32.xlu0 %v149_v46 }
 0x144   :  { %v148_v54 = vpop.xlane.xlu0 %147 }
 0x145   :  { %v159_v55 = vmul.f32 %v158_v53, %v148_v54 }
 0x147   :  { %v161_v56 = vsub.f32 %v118_v39, %v159_v55  ;;  %v162_v57 = vsub.f32 %v141_v40, %v159_v55 }
 0x149   :  { %v165_v58 = vmul.f32 %v161_v56, %v161_v56  ;;  %v166_v59 = vmul.f32 %v162_v57, %v162_v57 }
 0x14b   :  { %v169_v60 = vadd.f32 %v166_v59, %v165_v58 }
 0x14c   :  { %v151_v61 = vpop.xlane.xlu0 %150 }
 0x14d   :  { %v160_v62 = vmul.f32 %v158_v53, %v151_v61  ;;  %170 = vadd.xlane.f32.xlu1 %v169_v60 }
 0x14f   :  { %v163_v63 = vsub.f32 %v121_v44, %v160_v62  ;;  %v164_v0 = vsub.f32 %v144_v45, %v160_v62 }
 0x151   :  { %v167_v1 = vmul.f32 %v163_v63, %v163_v63  ;;  %v168_v2 = vmul.f32 %v164_v0, %v164_v0 }
 0x153   :  { %v172_v3 = vadd.f32 %v168_v2, %v167_v1 }
 0x155   :  { %173 = vadd.xlane.f32.xlu1 %v172_v3 }
 0x1c0   :  { %v171_v4 = vpop.xlane.xlu1 %170 }
 0x1c1   :  { %v175_v5 = vmul.f32 %v171_v4, %v158_v53 }
 0x1c3   :  { %v177_v6 = vadd.f32 1e-05, %v175_v5 }
 0x1c5   :  { %450 = vrsqrt.f32 %v177_v6  ;;  %vm185_vm2 = vweird.f32 %v177_v6 }
 0x1c8   :  { %v174_v7 = vpop.xlane.xlu1 %173 }
 0x1c9   :  { %v176_v8 = vmul.f32 %v174_v7, %v158_v53 }
 0x1cb   :  { %v451_v9 = vpop.eup %450  ;;  %v178_v10 = vadd.f32 1e-05, %v176_v8 }
 0x1cc   :  { %v180_v11 = vmul.f32 %v451_v9, %v177_v6  ;;  %vm186_vm1 = vweird.f32 %v451_v9 }
 0x1cd   :  { %452 = vrsqrt.f32 %v178_v10  ;;  %vm187_vm3 = vmor %vm185_vm2, %vm186_vm1  ;;  %vm195_vm5 = vweird.f32 %v178_v10 }
 0x1ce   :  { %v181_v12 = vmul.f32 %v451_v9, %v180_v11 }
 0x1d0   :  { %v182_v13 = vmul.f32 0.5, %v181_v12 }
 0x1d2   :  { %v183_v14 = vsub.f32 1.5, %v182_v13 }
 0x1d3   :  { %v453_v15 = vpop.eup %452 }
 0x1d4   :  { %v184_v16 = vmul.f32 %v451_v9, %v183_v14  ;;  %v190_v17 = vmul.f32 %v453_v15, %v178_v10  ;;  %vm196_vm4 = vweird.f32 %v453_v15 }
 0x1d5   :  { %vm197_vm6 = vmor %vm195_vm5, %vm196_vm4 }
 0x1d6   :  { %v188_v18 = vsel %vm187_vm3, %v451_v9, %v184_v16  ;;  %v191_v19 = vmul.f32 %v453_v15, %v190_v17 }
 0x1d7   :  { %v602_v20 = vmul.f32 %v188_v18, %v161_v56  ;;  %v604_v21 = vmul.f32 %v188_v18, %v162_v57 }
 0x1d8   :  { %v192_v22 = vmul.f32 0.5, %v191_v19 }
 0x1d9   :  { %v607_v23 = vmul.f32 0.70710677, %v602_v20  ;;  %v610_v24 = vmul.f32 0.70710677, %v604_v21 }
 0x1da   :  { %v193_v25 = vsub.f32 1.5, %v192_v22 }
 0x1db   :  { %v211_v26 = vmul.f32 %v607_v23, %v607_v23  ;;  %v251_v27 = vmul.f32 %v610_v24, %v610_v24 }
 0x1dc   :  { %v194_v28 = vmul.f32 %v453_v15, %v193_v25 }
 0x1dd   :  { %v212_v29 = vmin.f32 %v211_v26, 16.0  ;;  %v616_v30 = vmin.f32 %v251_v27, 16.0 }
 0x1de   :  { %v198_v31 = vsel %vm197_vm6, %v453_v15, %v194_v28 }
 0x1df   :  { %v213_v32 = vmul.f32 2.1237322e-06, %v212_v29  ;;  %v224_v33 = vmul.f32 3.8918573e-05, %v212_v29  ;;  %v253_v34 = vmul.f32 2.1237322e-06, %v616_v30  ;;  %v619_v35 = vmul.f32 %v198_v31, %v163_v63 }
 0x1e0   :  { %v264_v36 = vmul.f32 3.8918573e-05, %v616_v30  ;;  %v622_v37 = vmul.f32 %v198_v31, %v164_v0 }
 0x1e1   :  { %v214_v38 = vadd.f32 0.00028619796, %v213_v32  ;;  %v225_v39 = vadd.f32 0.001143296, %v224_v33  ;;  %v254_v40 = vadd.f32 0.00028619796, %v253_v34 }
 0x1e2   :  { %v265_v41 = vadd.f32 0.001143296, %v264_v36  ;;  %v625_v42 = vmul.f32 0.70710677, %v619_v35  ;;  %v629_v46 = vmul.f32 0.70710677, %v622_v37 }
 0x1e3   :  { %v215_v43 = vmul.f32 %v214_v38, %v212_v29  ;;  %v226_v44 = vmul.f32 %v225_v39, %v212_v29  ;;  %v255_v45 = vmul.f32 %v254_v40, %v616_v30 }
 0x1e4   :  { %v266_v47 = vmul.f32 %v265_v41, %v616_v30  ;;  %v291_v48 = vmul.f32 %v625_v42, %v625_v42  ;;  %v331_v52 = vmul.f32 %v629_v46, %v629_v46 }
 0x1e5   :  { %v216_v49 = vadd.f32 0.0036580483, %v215_v43  ;;  %v227_v50 = vadd.f32 0.014752088, %v226_v44  ;;  %v256_v51 = vadd.f32 0.0036580483, %v255_v45 }
 0x1e6   :  { %v267_v53 = vadd.f32 0.014752088, %v266_v47  ;;  %v636_v54 = vmin.f32 %v291_v48, 16.0  ;;  %v639_v58 = vmin.f32 %v331_v52, 16.0 }
 0x1e7   :  { %v217_v55 = vmul.f32 %v216_v49, %v212_v29  ;;  %v228_v56 = vmul.f32 %v227_v50, %v212_v29  ;;  %v257_v57 = vmul.f32 %v256_v51, %v616_v30 }
 0x1e8   :  { %v268_v59 = vmul.f32 %v267_v53, %v616_v30  ;;  %v293_v60 = vmul.f32 2.1237322e-06, %v636_v54  ;;  %v304_v61 = vmul.f32 3.8918573e-05, %v636_v54  ;;  %v333_v6 = vmul.f32 2.1237322e-06, %v639_v58 }
 0x1e9   :  { %v218_v62 = vadd.f32 0.05243302, %v217_v55  ;;  %v229_v63 = vadd.f32 0.112945676, %v228_v56  ;;  %v258_v5 = vadd.f32 0.05243302, %v257_v57 }
 0x1ea   :  { %v269_v0 = vadd.f32 0.112945676, %v268_v59  ;;  %v294_v1 = vadd.f32 0.00028619796, %v293_v60  ;;  %v305_v2 = vadd.f32 0.001143296, %v304_v61 }
 0x1eb   :  { %v219_v3 = vmul.f32 %v218_v62, %v212_v29  ;;  %v230_v4 = vmul.f32 %v229_v63, %v212_v29  ;;  %v344_v10 = vmul.f32 3.8918573e-05, %v639_v58  ;;  %v259_v16 = vmul.f32 %v258_v5, %v616_v30 }
 0x1ec   :  { %v270_v7 = vmul.f32 %v269_v0, %v616_v30  ;;  %v295_v8 = vmul.f32 %v294_v1, %v636_v54  ;;  %v306_v9 = vmul.f32 %v305_v2, %v636_v54  ;;  %v334_v22 = vadd.f32 0.00028619796, %v333_v6 }
 0x1ed   :  { %v231_v11 = vadd.f32 0.4994258, %v230_v4  ;;  %v220_v14 = vadd.f32 0.18741608, %v219_v3  ;;  %v345_v25 = vadd.f32 0.001143296, %v344_v10 }
 0x1ee   :  { %v271_v12 = vadd.f32 0.4994258, %v270_v7  ;;  %v307_v13 = vadd.f32 0.014752088, %v306_v9  ;;  %v296_v17 = vadd.f32 0.0036580483, %v295_v8  ;;  %v335_v36 = vmul.f32 %v334_v22, %v639_v58 }
 0x1ef   :  { %v232_v15 = vmul.f32 %v231_v11, %v212_v29  ;;  %v346_v31 = vmul.f32 %v345_v25, %v639_v58  ;;  %v221_v32 = vmul.f32 %v220_v14, %v212_v29  ;;  %v260_v33 = vadd.f32 0.18741608, %v259_v16 }
 0x1f0   :  { %v272_v18 = vmul.f32 %v271_v12, %v616_v30  ;;  %v308_v19 = vmul.f32 %v307_v13, %v636_v54  ;;  %v297_v34 = vmul.f32 %v296_v17, %v636_v54  ;;  %v336_v45 = vadd.f32 0.0036580483, %v335_v36 }
 0x1f1   :  { %v233_v26 = vadd.f32 1.0, %v232_v15  ;;  %v347_v39 = vadd.f32 0.014752088, %v346_v31  ;;  %v222_v40 = vadd.f32 1.1283791, %v221_v32  ;;  %v261_v41 = vmul.f32 %v260_v33, %v616_v30 }
 0x1f2   :  { %v273_v27 = vadd.f32 1.0, %v272_v18  ;;  %v309_v28 = vadd.f32 0.112945676, %v308_v19  ;;  %v298_v43 = vadd.f32 0.05243302, %v297_v34  ;;  %v337_v30 = vmul.f32 %v336_v45, %v639_v58 }
 0x1f3   :  { %454 = vrcp.f32 %v233_v26  ;;  %v348_v47 = vmul.f32 %v347_v39, %v639_v58  ;;  %v223_v51 = vmul.f32 %v222_v40, %v607_v23  ;;  %v262_v52 = vadd.f32 1.1283791, %v261_v41 }
 0x1f4   :  { %456 = vrcp.f32 %v273_v27  ;;  %v310_v38 = vmul.f32 %v309_v28, %v636_v54  ;;  %v299_v57 = vmul.f32 %v298_v43, %v636_v54  ;;  %v243_v60 = vand.u32 2147483647, %v233_v26 }
 0x1f5   :  { %v349_v55 = vadd.f32 0.112945676, %v348_v47  ;;  %v245_v61 = vand.u32 2147483648, %v233_v26  ;;  %v285_v1 = vand.u32 2147483648, %v273_v27  ;;  %v283_v2 = vand.u32 2147483647, %v273_v27 }
 0x1f6   :  { %v311_v44 = vadd.f32 0.4994258, %v310_v38  ;;  %vm239_vm9 = vweird.f32 %v233_v26  ;;  %v300_v5 = vadd.f32 0.18741608, %v299_v57  ;;  %v338_v6 = vadd.f32 0.05243302, %v337_v30 }
 0x1f7   :  { %v350_v63 = vmul.f32 %v349_v55, %v639_v58  ;;  %v246_v7 = vor.u32 1.1754944e-38, %v245_v61  ;;  %vm279_vm11 = vweird.f32 %v273_v27  ;;  %vm244_vm12 = vcmp.eq.f32.partialorder %v243_v60, 8.507059e+37 }
 0x1f8   :  { %v312_v50 = vmul.f32 %v311_v44, %v636_v54  ;;  %v263_v11 = vmul.f32 %v262_v52, %v610_v24  ;;  %v286_v12 = vor.u32 1.1754944e-38, %v285_v1  ;;  %vm284_vm14 = vcmp.eq.f32.partialorder %v283_v2, 8.507059e+37 }
 0x1f9   :  { %v455_v48 = vpop.eup %454  ;;  %v351_v3 = vadd.f32 0.4994258, %v350_v63  ;;  %v301_v19 = vmul.f32 %v300_v5, %v636_v54  ;;  %v339_v22 = vmul.f32 %v338_v6, %v639_v58  ;;  %v203_v24 = vmul.f32 0.5, %v602_v20 }
 0x1fa   :  { %v457_v29 = vpop.eup %456  ;;  %v235_v49 = vmul.f32 %v455_v48, %v233_v26  ;;  %v661_v59 = vadd.f32 1.0, %v312_v50  ;;  %vm240_vm7 = vweird.f32 %v455_v48  ;;  %v204_v28 = vmul.f32 0.5, %v604_v21 }
 0x1fb   :  { %v275_v53 = vmul.f32 %v457_v29, %v273_v27  ;;  %vm280_vm8 = vweird.f32 %v457_v29  ;;  %vm241_vm10 = vmor %vm239_vm9, %vm240_vm7  ;;  %v352_v9 = vmul.f32 %v351_v3, %v639_v58  ;;  %v302_v34 = vadd.f32 1.1283791, %v301_v19 }
 0x1fc   :  { %v236_v56 = vsub.f32 1.0, %v235_v49  ;;  %458 = vrcp.f32 %v661_v59  ;;  %vm281_vm13 = vmor %vm279_vm11, %vm280_vm8  ;;  %v325_v36 = vand.u32 2147483648, %v661_v59  ;;  %v340_v38 = vadd.f32 0.18741608, %v339_v22 }
 0x1fd   :  { %v276_v62 = vsub.f32 1.0, %v275_v53  ;;  %v353_v15 = vadd.f32 1.0, %v352_v9  ;;  %v323_v40 = vand.u32 2147483647, %v661_v59  ;;  %vm319_vm0 = vweird.f32 %v661_v59 }
 0x1fe   :  { %v237_v0 = vmul.f32 %v455_v48, %v236_v56  ;;  %v326_v21 = vor.u32 1.1754944e-38, %v325_v36  ;;  %v341_v45 = vmul.f32 %v340_v38, %v639_v58  ;;  %v303_v47 = vmul.f32 %v302_v34, %v625_v42 }
 0x1ff   :  { %v277_v23 = vmul.f32 %v457_v29, %v276_v62  ;;  %460 = vrcp.f32 %v353_v15  ;;  %vm324_vm2 = vcmp.eq.f32.partialorder %v323_v40, 8.507059e+37  ;;  %v365_v53 = vand.u32 2147483648, %v353_v15 }
 0x200   :  { %v238_v4 = vadd.f32 %v455_v48, %v237_v0  ;;  %v342_v52 = vadd.f32 1.1283791, %v341_v45  ;;  %v363_v57 = vand.u32 2147483647, %v353_v15  ;;  %vm359_vm4 = vweird.f32 %v353_v15 }
 0x201   :  { %v278_v8 = vadd.f32 %v457_v29, %v277_v23  ;;  %v366_v60 = vor.u32 1.1754944e-38, %v365_v53 }
 0x202   :  { %v242_v10 = vsel %vm241_vm10, %v455_v48, %v238_v4  ;;  %v459_v16 = vpop.eup %458  ;;  %v343_v42 = vmul.f32 %v342_v52, %v629_v46  ;;  %vm364_vm6 = vcmp.eq.f32.partialorder %v363_v57, 8.507059e+37 }
 0x203   :  { %v247_v13 = vsel %vm244_vm12, %v246_v7, %v242_v10  ;;  %v282_v14 = vsel %vm281_vm13, %v457_v29, %v278_v8  ;;  %v315_v26 = vmul.f32 %v459_v16, %v661_v59  ;;  %vm320_vm15 = vweird.f32 %v459_v16 }
 0x204   :  { %v248_v17 = vmul.f32 %v247_v13, %v223_v51  ;;  %v287_v18 = vsel %vm284_vm14, %v286_v12, %v282_v14  ;;  %vm321_vm1 = vmor %vm319_vm0, %vm320_vm15  ;;  %v205_v59 = vmul.f32 0.5, %v619_v35  ;;  %v206_v35 = vmul.f32 0.5, %v622_v37 }
 0x205   :  { %v288_v25 = vmul.f32 %v287_v18, %v263_v11  ;;  %v316_v32 = vsub.f32 1.0, %v315_v26  ;;  %v461_v20 = vpop.eup %460 }
 0x206   :  { %v403_v27 = vclamps-f32 %v248_v17, 1.0  ;;  %v355_v29 = vmul.f32 %v461_v20, %v353_v15  ;;  %vm360_vm3 = vweird.f32 %v461_v20 }
 0x207   :  { %v404_v31 = vclamps-f32 %v288_v25, 1.0  ;;  %v317_v54 = vmul.f32 %v459_v16, %v316_v32  ;;  %vm361_vm5 = vmor %vm359_vm4, %vm360_vm3 }
 0x208   :  { %v371_v33 = vadd.f32 1.0, %v403_v27  ;;  %v356_v51 = vsub.f32 1.0, %v355_v29 }
 0x209   :  { %v372_v39 = vadd.f32 1.0, %v404_v31  ;;  %v318_v44 = vadd.f32 %v459_v16, %v317_v54 }
 0x20a   :  { %v375_v41 = vmul.f32 %v371_v33, %v203_v24  ;;  %v357_v56 = vmul.f32 %v461_v20, %v356_v51 }
 0x20b   :  { %v376_v43 = vmul.f32 %v372_v39, %v204_v28  ;;  %v322_v48 = vsel %vm321_vm1, %v459_v16, %v318_v44 }
 0x20c   :  { %379 = vst [vmem:[#allocation8] sm:$0xff] %v375_v41  ;;  %v327_v49 = vsel %vm324_vm2, %v326_v21, %v322_v48  ;;  %v358_v30 = vadd.f32 %v461_v20, %v357_v56 }
 0x20d   :  { %380 = vst [vmem:[#allocation8 + $0x8] sm:$0xff] %v376_v43  ;;  %v328_v50 = vmul.f32 %v327_v49, %v303_v47 }
 0x20e   :  { %v362_v61 = vsel %vm361_vm5, %v461_v20, %v358_v30 }
 0x20f   :  { %v405_v55 = vclamps-f32 %v328_v50, 1.0  ;;  %v367_v63 = vsel %vm364_vm6, %v366_v60, %v362_v61 }
 0x210   :  { %v368_v0 = vmul.f32 %v367_v63, %v343_v42 }
 0x211   :  { %v373_v58 = vadd.f32 1.0, %v405_v55 }
 0x212   :  { %v406_v1 = vclamps-f32 %v368_v0, 1.0 }
 0x213   :  { %v377_v62 = vmul.f32 %v373_v58, %v205_v59 }
 0x214   :  { %v374_v23 = vadd.f32 1.0, %v406_v1 }
 0x215   :  { %381 = vst [vmem:[#allocation8 + $0x10] sm:$0xff] %v377_v62 }
 0x216   :  { %v378_v2 = vmul.f32 %v374_v23, %v206_v35 }
 0x218   :  { %382 = vst [vmem:[#allocation8 + $0x18] sm:$0xff] %v378_v2 }
 0x219   :  { %395 = dma.vmem_to_hbm [thread:$0]  %s388_s2, 512, %s390_s30, [#allocation4], %s571_s4, %s571_s4, %s572_s5  }
 0x21a   :  { %562 = dma.done.wait [#allocation4], 512  }
 0x21b   :  { %563 = vsyncadd [#allocation4], 4294966784 }
 0x21c   :  { %400 = vsyncpa [#allocation3], 1 }
 0x21d   :  { %401 = vsyncpa [#allocation6], 1 }
 0x21e   :  { %402 = vsyncpa [#allocation4], 1 }

</bundles_post_ra>
